<compile_context>
chip_gen: v5e
topology: v5e:2x2
jax: 0.10.0
libtpu: 0.0.40
codegen_flags: <defaults>
</compile_context>

<pallas_src>
import jax
import jax.numpy as jnp
from jax.experimental import pallas as pl
from jax.experimental.pallas import tpu as pltpu


# ----------------------------- Pallas kernels --------------------------------

def _base_kernel(x_ref, w_ref, b_ref, o_ref, acc_ref):
    # Grid: (i over M tiles, j over nf tiles, k over nx tiles); k is the
    # reduction axis (innermost, "arbitrary"), acc_ref is an f32 accumulator.
    k = pl.program_id(2)

    @pl.when(k == 0)
    def _init():
        acc_ref[...] = jnp.zeros_like(acc_ref)

    acc_ref[...] += jnp.dot(x_ref[...], w_ref[...],
                            preferred_element_type=jnp.float32)

    @pl.when(k == pl.num_programs(2) - 1)
    def _finalize():
        o_ref[...] = (acc_ref[...] + b_ref[...].astype(jnp.float32)
                      ).astype(o_ref.dtype)


def _lora_fused_kernel(x_ref, w_ref, b_ref, a_ref, bb_ref, o_ref,
                       acc_ref, u_ref):
    # Same as _base_kernel plus the concatenated low-rank LoRA delta
    # (B_cat pre-scaled by `scaling`).  u = x @ A_cat does not depend on j, so
    # it is accumulated into VMEM scratch only while j == 0 and reused for all
    # remaining nf tiles of the same M tile (j axis is kept sequential).
    j = pl.program_id(1)
    k = pl.program_id(2)

    @pl.when(k == 0)
    def _init():
        acc_ref[...] = jnp.zeros_like(acc_ref)

    @pl.when((j == 0) & (k == 0))
    def _init_u():
        u_ref[...] = jnp.zeros_like(u_ref)

    x = x_ref[...]
    acc_ref[...] += jnp.dot(x, w_ref[...], preferred_element_type=jnp.float32)

    @pl.when(j == 0)
    def _accum_u():
        u_ref[...] += jnp.dot(x, a_ref[...],
                              preferred_element_type=jnp.float32)

    @pl.when(k == pl.num_programs(2) - 1)
    def _finalize():
        acc = acc_ref[...] + b_ref[...].astype(jnp.float32)
        acc = acc + jnp.dot(u_ref[...].astype(bb_ref.dtype), bb_ref[...],
                            preferred_element_type=jnp.float32)
        o_ref[...] = acc.astype(o_ref.dtype)


# ------------------------------ helpers ---------------------------------------

def _round_up(v, m):
    return ((v + m - 1) // m) * m


def _vmem_capacity_bytes():
    try:
        info = pltpu.get_tpu_info()
        for name in ("vmem_capacity_bytes", "vmem_bytes", "vmem_size_bytes"):
            cap = getattr(info, name, None)
            if cap:
                return int(cap)
    except Exception:
        pass
    return 64 * 1024 * 1024  # conservative fallback (v7x per-TensorCore)


def _choose_tk(nx, tk_req):
    """Reduction (nx) tile: full-K single block when small; otherwise a
    128-multiple, preferring one that divides nx so x needs no K padding."""
    tk_req = max(128, tk_req)
    if nx <= tk_req:
        return nx
    top = (min(tk_req, nx) // 128) * 128
    for cand in range(top, 127, -128):
        if nx % cand == 0:
            return cand
    return top  # last resort: nx gets zero-padded up to a multiple of tk


# ------------------------------- Wrapper --------------------------------------

def make_our_conv1d(weight, bias, lora=None, *, compute_dtype=None,
                    fold_lora=None, tm=None, tn=512, tk=512):
    """Build a reusable forward fn for OurConv1D: y = x @ W + b (+ LoRA delta).

    weight: (nx, nf); bias: (nf,).
    lora: optional (A_U, B_U, A_I, B_I, scaling) with nn.Linear layouts
          A_*: (r, nx), B_*: (nf, r).  (lora_dropout is identity at p=0/eval.)
    compute_dtype: MXU operand dtype (default: weight.dtype). bf16 gives
          2-4x MXU throughput and halves W/x DMA bytes; accumulation stays f32.
    fold_lora: fold the low-rank delta into an effective weight (once, in f32).
          Defaults to True at f32 compute, False at sub-f32 compute so a lossy
          weight cast cannot drop the adapter.

    All weight padding / folding / casting happens once here — cache and reuse
    the returned closure for inference.
    """
    nx, nf = weight.shape
    compute_dtype = jnp.dtype(compute_dtype if compute_dtype is not None
                              else weight.dtype)
    in_isz = compute_dtype.itemsize
    if fold_lora is None:
        fold_lora = in_isz >= 4

    vmem_cap = _vmem_capacity_bytes()
    vmem_budget = int(0.75 * vmem_cap)            # headroom below physical cap
    if tm is None:
        # 128 MiB parts (v5e/v6e) can afford deeper M tiles (halves W traffic);
        # v7x (64 MiB / TC) stays at 512.
        tm = 1024 if vmem_cap >= (100 << 20) else 512

    # --- static tile geometry ---
    nf_pad = _round_up(nf, 128)                   # lane-dense output stores
    tn = min(_round_up(max(tn, 128), 128), nf_pad)
    nf_pad = _round_up(nf_pad, tn)
    tk = _choose_tk(nx, tk)
    nx_pad = _round_up(nx, tk)

    # --- prepare weights once (fold in f32, pad, cast to compute dtype) ---
    f32 = jnp.float32
    w_f32 = weight.astype(f32)
    a_cat_f32 = bb_cat_f32 = None
    if lora is not None:
        a_u, b_u, a_i, b_i, scaling = lora
        a_cat_f32 = jnp.concatenate([a_u, a_i], axis=0).T.astype(f32)   # (nx, 2r)
        bb_cat_f32 = (jnp.concatenate([b_u.T, b_i.T], axis=0).astype(f32)
                      * jnp.asarray(scaling, f32))                      # (2r, nf)
        if fold_lora:
            w_f32 = w_f32 + jnp.dot(a_cat_f32, bb_cat_f32)
            a_cat_f32 = bb_cat_f32 = None

    def _pad2(a, rows, cols):
        r, c = a.shape
        if rows == r and cols == c:
            return a
        return jnp.pad(a, ((0, rows - r), (0, cols - c)))

    w_prep = _pad2(w_f32, nx_pad, nf_pad).astype(compute_dtype)
    b_prep = _pad2(bias.reshape(1, nf).astype(f32), 1, nf_pad)           # bias stays f32
    fused = a_cat_f32 is not None
    if fused:
        two_r = a_cat_f32.shape[1]
        a_prep = _pad2(a_cat_f32, nx_pad, two_r).astype(compute_dtype)
        bb_prep = _pad2(bb_cat_f32, two_r, nf_pad).astype(compute_dtype)
    else:
        two_r = 0
        a_prep = bb_prep = None

    tm_req = tm

    def forward(x):
        assert x.shape[-1] == nx
        out_dtype = x.dtype
        out_isz = jnp.dtype(out_dtype).itemsize
        lead = x.shape[:-1]
        M = 1
        for d in lead:
            M *= d
        sub = 16 if min(in_isz, out_isz) < 4 else 8   # sublane granularity

        # --- M tile: as big as the per-core VMEM budget allows ---
        tm_ = _round_up(max(sub, min(tm_req, _round_up(M, sub))), sub)

        def vmem_est(tm__):
            est = 2 * (tm__ * tk + tk * tn) * in_isz   # x / W tiles (double-buffered)
            est += 2 * tn * 4                          # bias tile (f32)
            est += 2 * tm__ * tn * out_isz             # output tile
            est += tm__ * tn * 4                       # f32 accumulator scratch
            if fused:
                est += 2 * (tk * two_r + two_r * tn) * in_isz
                est += tm__ * two_r * 4                # u scratch
            return est

        while vmem_est(tm_) > vmem_budget and tm_ > sub:
            tm_ = max(sub, _round_up(tm_ // 2, sub))
        m_pad = _round_up(M, tm_)

        # --- pad / cast activations only when actually needed ---
        x2 = x.reshape(M, nx).astype(compute_dtype)
        if m_pad != M or nx_pad != nx:
            x2 = jnp.pad(x2, ((0, m_pad - M), (0, nx_pad - nx)))

        grid = (m_pad // tm_, nf_pad // tn, nx_pad // tk)
        x_spec = pl.BlockSpec((tm_, tk), lambda i, j, k: (i, k))
        w_spec = pl.BlockSpec((tk, tn), lambda i, j, k: (k, j))
        b_spec = pl.BlockSpec((1, tn), lambda i, j, k: (0, j))
        out_spec = pl.BlockSpec((tm_, tn), lambda i, j, k: (i, j))
        scratch = [pltpu.VMEM((tm_, tn), jnp.float32)]

        if not fused:
            params = pltpu.CompilerParams(
                dimension_semantics=("parallel", "parallel", "arbitrary"),
                vmem_limit_bytes=vmem_budget)
            out = pl.pallas_call(
                _base_kernel,
                out_shape=jax.ShapeDtypeStruct((m_pad, nf_pad), out_dtype),
                grid_spec=pltpu.PrefetchScalarGridSpec(
                    num_scalar_prefetch=0,
                    grid=grid,
                    in_specs=[x_spec, w_spec, b_spec],
                    out_specs=out_spec,
                    scratch_shapes=scratch),
                compiler_params=params,
            )(x2, w_prep, b_prep)
        else:
            # j stays "arbitrary" (sequential) because the u = x @ A_cat scratch
            # filled at j == 0 is reused by later j tiles of the same M tile.
            params = pltpu.CompilerParams(
                dimension_semantics=("parallel", "arbitrary", "arbitrary"),
                vmem_limit_bytes=vmem_budget)
            a_spec = pl.BlockSpec((tk, two_r), lambda i, j, k: (k, 0))
            bb_spec = pl.BlockSpec((two_r, tn), lambda i, j, k: (0, j))
            out = pl.pallas_call(
                _lora_fused_kernel,
                out_shape=jax.ShapeDtypeStruct((m_pad, nf_pad), out_dtype),
                grid_spec=pltpu.PrefetchScalarGridSpec(
                    num_scalar_prefetch=0,
                    grid=grid,
                    in_specs=[x_spec, w_spec, b_spec, a_spec, bb_spec],
                    out_specs=out_spec,
                    scratch_shapes=scratch
                    + [pltpu.VMEM((tm_, two_r), jnp.float32)]),
                compiler_params=params,
            )(x2, w_prep, b_prep, a_prep, bb_prep)

        if m_pad != M or nf_pad != nf:
            out = out[:M, :nf]
        return out.reshape(*lead, nf)

    return forward


def our_conv1d(x, weight, bias, lora=None, **kwargs):
    """One-shot convenience wrapper (prefer make_our_conv1d + reuse so weight
    padding / folding / casting is not redone every call)."""
    kwargs.setdefault("compute_dtype", x.dtype)
    return make_our_conv1d(weight, bias, lora, **kwargs)(x)


# ----------------------------- Pure-JAX reference -----------------------------

def ref_forward(x, weight, bias, lora=None):
    base = x @ weight + bias
    if lora is None:
        return base
    a_u, b_u, a_i, b_i, s = lora
    return base + s * ((x @ a_u.T) @ b_u.T + (x @ a_i.T) @ b_i.T)


# ---------------------------------- Main ---------------------------------------

if __name__ == "__main__":
    key = jax.random.PRNGKey(0)
    k_x, k_w, k_au, k_ai, k_bu, k_bi = jax.random.split(key, 6)

    B, S = 2, 8
    nx, nf = 32, 64
    r = 4
    lora_alpha = 8
    scaling = lora_alpha / r

    # Deterministic parameter init (mirrors __init__ / injecting_parameters):
    weight = 0.02 * jax.random.normal(k_w, (nx, nf), dtype=jnp.float32)  # normal_(std=0.02)
    bias = jnp.zeros((nf,), dtype=jnp.float32)                            # zeros

    # LoRA A: kaiming-uniform-like deterministic init; LoRA B is zeros in the
    # real module (delta = 0 at init) — use small nonzero values here so the
    # LoRA path is actually exercised numerically.
    bound_a = (6.0 / ((1.0 + 5.0) * nx)) ** 0.5
    a_u = jax.random.uniform(k_au, (r, nx), jnp.float32, -bound_a, bound_a)
    a_i = jax.random.uniform(k_ai, (r, nx), jnp.float32, -bound_a, bound_a)
    b_u = 0.01 * jax.random.normal(k_bu, (nf, r), dtype=jnp.float32)
    b_i = 0.01 * jax.random.normal(k_bi, (nf, r), dtype=jnp.float32)

    x = jax.random.normal(k_x, (B, S, nx), dtype=jnp.float32)
    lora = (a_u, b_u, a_i, b_i, scaling)

    # 1) Base path (lora_config is None), f32 compute
    y_base = jax.block_until_ready(our_conv1d(x, weight, bias))
    assert y_base.shape == (B, S, nf)
    assert jnp.allclose(y_base, ref_forward(x, weight, bias), atol=1e-5, rtol=1e-4)

    y_lora_ref = ref_forward(x, weight, bias, lora)

    # 2) LoRA path, delta folded into the effective weight (default at f32)
    y_fold = jax.block_until_ready(
        our_conv1d(x, weight, bias, lora=lora, fold_lora=True))
    assert y_fold.shape == (B, S, nf)
    assert jnp.allclose(y_fold, y_lora_ref, atol=1e-5, rtol=1e-4)

    # 3) LoRA path, fused in-kernel low-rank delta (weights kept separate)
    y_fused = jax.block_until_ready(
        our_conv1d(x, weight, bias, lora=lora, fold_lora=False))
    assert jnp.allclose(y_fused, y_lora_ref, atol=1e-5, rtol=1e-4)

    # 4) bf16 MXU-native compute (f32 accumulation); fold_lora defaults to False
    #    here so the adapter delta is not rounded away by a bf16 weight cast.
    y_bf16 = jax.block_until_ready(
        our_conv1d(x, weight, bias, lora=lora, compute_dtype=jnp.bfloat16))
    assert y_bf16.dtype == x.dtype
    assert jnp.allclose(y_bf16, y_lora_ref, atol=2e-2, rtol=2e-2)

    # 5) Reusable prepared-weight path (weights padded/folded/cast exactly once)
    fwd = make_our_conv1d(weight, bias, lora=lora, compute_dtype=jnp.float32)
    y_prep = jax.block_until_ready(fwd(x))
    assert jnp.allclose(y_prep, y_lora_ref, atol=1e-5, rtol=1e-4)

    print("KERNEL_OK")
</pallas_src>

<mosaic_0001>
module attributes {stable_mosaic.version = 11 : i64} {
  func.func @_base_kernel(%arg0: i32, %arg1: i32, %arg2: i32, %arg3: memref<16x32xf32, #tpu.memory_space<vmem>>, %arg4: memref<32x128xf32, #tpu.memory_space<vmem>>, %arg5: memref<1x128xf32, #tpu.memory_space<vmem>>, %arg6: memref<16x128xf32, #tpu.memory_space<vmem>>, %arg7: memref<16x128xf32, #tpu.memory_space<vmem>>) attributes {dimension_semantics = [#tpu.dimension_semantics<parallel>, #tpu.dimension_semantics<parallel>, #tpu.dimension_semantics<arbitrary>], iteration_bounds = array<i64: 1, 1, 1>, scalar_prefetch = 0 : i64, scratch_operands = 1 : i64, tpu.core_type = #tpu.core_type<tc>, window_params = [{transform_indices = @transform_0, window_bounds = array<i64: 16, 32>}, {transform_indices = @transform_1, window_bounds = array<i64: 32, 128>}, {transform_indices = @transform_2, window_bounds = array<i64: 1, 128>}, {transform_indices = @transform_3, window_bounds = array<i64: 16, 128>}]} {
    %c0_i32 = arith.constant 0 : i32
    %0 = arith.cmpi eq, %arg2, %c0_i32 : i32
    %1 = arith.extui %0 : i1 to i32
    %c0_i32_0 = arith.constant 0 : i32
    %2 = arith.cmpi ne, %1, %c0_i32_0 : i32
    scf.if %2 {
      %cst_10 = arith.constant 0.000000e+00 : f32
      %12 = vector.broadcast %cst_10 : f32 to vector<16x128xf32>
      %c0_11 = arith.constant 0 : index
      %c0_12 = arith.constant 0 : index
      %13 = vector.load %arg7[%c0_11, %c0_12] : memref<16x128xf32, #tpu.memory_space<vmem>>, vector<16x128xf32>
      tpu.vector_store %arg7[%c0_11, %c0_12], %12 {strides = array<i32>} : memref<16x128xf32, #tpu.memory_space<vmem>>, vector<16x128xf32>,
    } else {
    }
    %c0 = arith.constant 0 : index
    %c0_1 = arith.constant 0 : index
    %3 = vector.load %arg7[%c0, %c0_1] : memref<16x128xf32, #tpu.memory_space<vmem>>, vector<16x128xf32>
    %c0_2 = arith.constant 0 : index
    %c0_3 = arith.constant 0 : index
    %4 = vector.load %arg3[%c0_2, %c0_3] : memref<16x32xf32, #tpu.memory_space<vmem>>, vector<16x32xf32>
    %c0_4 = arith.constant 0 : index
    %c0_5 = arith.constant 0 : index
    %5 = vector.load %arg4[%c0_4, %c0_5] : memref<32x128xf32, #tpu.memory_space<vmem>>, vector<32x128xf32>
    %cst = arith.constant dense<0.000000e+00> : vector<16x128xf32>
    %6 = tpu.matmul %4, %5, %cst {dimension_numbers = #tpu.dot_dimension_numbers<[1], [0], [0], [1], [0, 0, 1, 1], [], []>} : vector<16x32xf32>, vector<32x128xf32>, vector<16x128xf32> -> vector<16x128xf32>
    %7 = arith.addf %3, %6 : vector<16x128xf32>
    %c0_6 = arith.constant 0 : index
    %c0_7 = arith.constant 0 : index
    %8 = vector.load %arg7[%c0_6, %c0_7] : memref<16x128xf32, #tpu.memory_space<vmem>>, vector<16x128xf32>
    tpu.vector_store %arg7[%c0_6, %c0_7], %7 {strides = array<i32>} : memref<16x128xf32, #tpu.memory_space<vmem>>, vector<16x128xf32>,
    %c0_i32_8 = arith.constant 0 : i32
    %9 = arith.cmpi eq, %arg2, %c0_i32_8 : i32
    %10 = arith.extui %9 : i1 to i32
    %c0_i32_9 = arith.constant 0 : i32
    %11 = arith.cmpi ne, %10, %c0_i32_9 : i32
    scf.if %11 {
      %c0_10 = arith.constant 0 : index
      %c0_11 = arith.constant 0 : index
      %12 = vector.load %arg7[%c0_10, %c0_11] : memref<16x128xf32, #tpu.memory_space<vmem>>, vector<16x128xf32>
      %c0_12 = arith.constant 0 : index
      %c0_13 = arith.constant 0 : index
      %13 = vector.load %arg5[%c0_12, %c0_13] : memref<1x128xf32, #tpu.memory_space<vmem>>, vector<1x128xf32>
      %14 = vector.broadcast %13 : vector<1x128xf32> to vector<16x128xf32>
      %15 = arith.addf %12, %14 : vector<16x128xf32>
      %c0_14 = arith.constant 0 : index
      %c0_15 = arith.constant 0 : index
      %16 = vector.load %arg6[%c0_14, %c0_15] : memref<16x128xf32, #tpu.memory_space<vmem>>, vector<16x128xf32>
      tpu.vector_store %arg6[%c0_14, %c0_15], %15 {strides = array<i32>} : memref<16x128xf32, #tpu.memory_space<vmem>>, vector<16x128xf32>,
    } else {
    }
    return
  }
  func.func @transform_0(%arg0: i32, %arg1: i32, %arg2: i32) -> (i32, i32) {
    %c0_i32 = arith.constant 0 : i32
    return %arg0, %arg2 : i32, i32
  }
  func.func @transform_1(%arg0: i32, %arg1: i32, %arg2: i32) -> (i32, i32) {
    %c0_i32 = arith.constant 0 : i32
    return %arg2, %arg1 : i32, i32
  }
  func.func @transform_2(%arg0: i32, %arg1: i32, %arg2: i32) -> (i32, i32) {
    %c0_i32 = arith.constant 0 : i32
    %c0_i32_0 = arith.constant 0 : i32
    return %c0_i32, %arg1 : i32, i32
  }
  func.func @transform_3(%arg0: i32, %arg1: i32, %arg2: i32) -> (i32, i32) {
    %c0_i32 = arith.constant 0 : i32
    return %arg0, %arg1 : i32, i32
  }
}

</mosaic_0001>

<bundles_post_ra>
// kernel: tpu_custom_call.1
= control target key start
LH: loop header
LB: loop body
LE: loop exit
PB: predicated region body
PF: predicated region fallthrough
CT: control target
= control target key end

     0   :  { %8 = vsyncpa [#allocation4], 0  ;;  %s264_s0 = inlined_call_operand.hbm [shape: f32[16,32], index: 0, kind: input, shape index: {}]   ;;  %s265_s1 = inlined_call_operand.hbm [shape: f32[32,128], index: 1, kind: input, shape index: {}]   ;;  %s266_s2 = inlined_call_operand.vmem [shape: f32[1,128], index: 2, kind: input, shape index: {}]   ;;  %s267_s3 = inlined_call_operand.hbm [shape: f32[16,128], index: 3, kind: output, shape index: {}]  }
   0x1   :  { %9 = vsyncpa [#allocation7], 0 }
   0x2   :  { %10 = vsyncpa [#allocation5], 0  ;;  %s15_s14 = sshll.u32 %s264_s0, 4  ;;  %s218_s15 = smov [#allocation3]   ;;  %s16_s14 = int_to_ptr.hbm [resolvable:$true] %s15_s14 }
   0x3   :  { %s17_s16 = sshll.u32 %s218_s15, 4  ;;  %s28_s19 = sshll.u32 %s265_s1, 4  ;;  %s18_s16 = int_to_ptr.vmem [resolvable:$true] %s17_s16  ;;  %s29_s19 = int_to_ptr.hbm [resolvable:$true] %s28_s19 }
   0x4   :  { %s219_s20 = smov 128   ;;  %s220_s21 = smov 8  }
   0x5   :  { %23 = dma.hbm_to_vmem [thread:$0]  %s16_s14, 256, %s18_s16, [#allocation4], %s219_s20, %s219_s20, %s220_s21  }
   0x6   :  { %s221_s22 = smov [#allocation6]  }
   0x7   :  { %s30_s23 = sshll.u32 %s221_s22, 4  ;;  %s31_s23 = int_to_ptr.vmem [resolvable:$true] %s30_s23 }
   0x8   :  { %36 = dma.hbm_to_vmem [thread:$0]  %s29_s19, 512, %s31_s23, [#allocation7], %s219_s20, %s219_s20, %s220_s21  }
   0x9   :  { %212 = dma.done.wait [#allocation4], 256  }
   0xa   :  { %213 = vsyncadd [#allocation4], 4294967040 }
   0xb   :  { %214 = dma.done.wait [#allocation7], 512  }
   0xc   :  { %215 = vsyncadd [#allocation7], 4294966784  ;;  %v60_v0 = vld [vmem:[#allocation6 + $0x18] sm:$0xff]  ;;  %v59_v1 = vld [vmem:[#allocation6 + $0x10] sm:$0xff]  ;;  %vm61_vm0 = vcmask 261120   ;;  %s222_s24 = smov [#allocation8]  }
   0xd   :  { %80 = vmatpush.msra.mxu0 %v60_v0  ;;  %130 = vmatpush.msra.mxu1 %v60_v0  ;;  %v58_v2 = vld [vmem:[#allocation6 + $0x8] sm:$0xff]  ;;  %v57_v3 = vld [vmem:[#allocation6] sm:$0xff]  ;;  %v55_v4 = vld [vmem:[#allocation3] sm:$0xff]  ;;  %s112_s25 = sshll.u32 %s222_s24, 4  ;;  %s114_s28 = sshll.u32 %s267_s3, 4  ;;  %s113_s25 = int_to_ptr.vmem [resolvable:$true] %s112_s25  ;;  %s115_s28 = int_to_ptr.hbm [resolvable:$true] %s114_s28 }
   0xe   :  { %v56_v5 = vld [vmem:[#allocation3 + $0x8] sm:$0xff]  ;;  %v139_v6 = vld [vmem:[%s266_s2] ss:$0 sm:$0xff] }
   0xf   :  { %81 = vmatpush.msra.mxu0 %v59_v1  ;;  %131 = vmatpush.msra.mxu1 %v59_v1 }
  0x11   :  { %82 = vmatpush.msra.mxu0 %v58_v2  ;;  %132 = vmatpush.msra.mxu1 %v58_v2 }
  0x13   :  { %83 = vmatpush.msra.mxu0 %v57_v3  ;;  %133 = vmatpush.msra.mxu1 %v57_v3 }
  0x14   :  { %128 = vmatmul.msk.f32.vlgmr.msra.gmra.mxu0 %vm61_vm0, %v55_v4  ;;  %129 = vmatmul.msk.f32.vlgmr.msra.gmra.mxu1 %vm61_vm0, %v56_v5 }
  0x91   :  { %v85_v7 = vpop.f32.mrf.mxu0  ;;  %v88_v8 = vpop.f32.mrf.mxu1 }
  0x92   :  { %v104_v9 = vadd.f32 %v139_v6, %v85_v7  ;;  %v105_v10 = vadd.f32 %v139_v6, %v88_v8 }
  0x94   :  { %106 = vst [vmem:[#allocation8] sm:$0xff] %v104_v9 }
  0x95   :  { %107 = vst [vmem:[#allocation8 + $0x8] sm:$0xff] %v105_v10 }
  0x96   :  { %120 = dma.vmem_to_hbm [thread:$0]  %s113_s25, 256, %s115_s28, [#allocation5], %s219_s20, %s219_s20, %s220_s21  }
  0x97   :  { %216 = dma.done.wait [#allocation5], 256  }
  0x98   :  { %217 = vsyncadd [#allocation5], 4294967040 }
  0x99   :  { %125 = vsyncpa [#allocation4], 1 }
  0x9a   :  { %126 = vsyncpa [#allocation7], 1 }
  0x9b   :  { %127 = vsyncpa [#allocation5], 1 }

</bundles_post_ra>
